<compile_context>
chip_gen: v5e
topology: v5e:2x2
jax: 0.10.0
libtpu: 0.0.40
codegen_flags: <defaults>
</compile_context>

<pallas_src>
import functools

import jax
import jax.numpy as jnp
from jax.experimental import pallas as pl
from jax.experimental.pallas import tpu as pltpu


# ----------------------------- kernels ------------------------------------------


def _transp_conv_kernel(x_ref, w_ref, b_ref, o_ref, *, compute_dtype):
    # x_ref: (tr*W, C_in)        activations (tr complete image rows)
    # w_ref: (C_in, 4*C_out)     packed ConvTranspose2d weights (compute_dtype)
    # b_ref: (1, 4*C_out)        bias (f32, tiled 4x)
    # o_ref: (tr, 2, W, 2*C_out) output rows, di interleaved on axis 1
    tr, _, w_pix, two_cout = o_ref.shape
    a = x_ref[...]
    if a.dtype != compute_dtype:
        a = a.astype(compute_dtype)          # bf16 MXU operands, f32 accumulate
    acc = jnp.dot(a, w_ref[...], preferred_element_type=jnp.float32)
    acc = (acc + b_ref[...]).astype(o_ref.dtype)
    # Column halves: [:2*C_out] -> output row 2i (di=0); [2*C_out:] -> row 2i+1 (di=1).
    o_ref[:, 0, :, :] = acc[:, :two_cout].reshape(tr, w_pix, two_cout)
    o_ref[:, 1, :, :] = acc[:, two_cout:].reshape(tr, w_pix, two_cout)


def _transp_conv_kernel_split(x_ref, w_ref, b_ref, o_ref, *, compute_dtype):
    # di-split variant: one di half per (inner) grid step.
    # x_ref: (tr*W, C_in);  w_ref: (1, C_in, 2*C_out);  b_ref: (1, 1, 2*C_out)
    # o_ref: (tr, 1, W, 2*C_out)
    tr, _, w_pix, two_cout = o_ref.shape
    a = x_ref[...]
    if a.dtype != compute_dtype:
        a = a.astype(compute_dtype)
    acc = jnp.dot(a, w_ref[0], preferred_element_type=jnp.float32)
    acc = (acc + b_ref[0]).astype(o_ref.dtype)
    o_ref[:, 0, :, :] = acc.reshape(tr, w_pix, two_cout)


# ----------------------------- helpers ------------------------------------------


def _sublane_multiple(dtype):
    # Minimum sublane tile: 8 for 4-byte, 16 for 2-byte, 32 for 1-byte dtypes.
    return max(8, 32 // jnp.dtype(dtype).itemsize)


def _vmem_budget():
    """Generation-aware budgets: (tile_budget, vmem_limit_cap, target_tokens)."""
    try:
        cap = int(pltpu.get_tpu_info().vmem_capacity_bytes)
    except Exception:
        cap = 64 << 20  # conservative fallback
    if cap <= (64 << 20):                      # v7x-class: 64 MiB / TensorCore
        return (40 << 20), (48 << 20), 2048
    return (56 << 20), (96 << 20), 8192        # v5e / v6e: 128 MiB VMEM


def _const_spec(block_shape, index_map):
    """BlockSpec for a block whose index never changes: single-buffer it."""
    try:
        return pl.BlockSpec(block_shape, index_map, pipeline_mode=pl.Buffered(1))
    except Exception:
        return pl.BlockSpec(block_shape, index_map)


def _choose_rows_per_tile(rows_total, W, per_row_bytes, fixed_bytes,
                          tile_budget_bytes, target_tokens, sublane_mult):
    """Largest divisor of rows_total keeping the pipelined working set in budget."""
    avail = max(tile_budget_bytes - fixed_bytes, per_row_bytes)
    cap = int(min(max(1, avail // per_row_bytes),
                  max(1, target_tokens // max(W, 1)),
                  rows_total))
    r = cap
    while r > 1 and (rows_total % r != 0 or (r * W) % sublane_mult != 0):
        r -= 1
    if rows_total % r != 0 or ((r * W) % sublane_mult != 0 and r != rows_total):
        r = rows_total  # single tile: block == full array, always a legal layout
    return r


# ----------------------------- entry points -------------------------------------


def upsample_transp_conv_nhwc(x_nhwc, weight, bias, *, rows_per_tile=None,
                              compute_dtype=jnp.bfloat16, out_dtype=jnp.bfloat16,
                              split_di=None):
    """ConvTranspose2d(C_in, C_out, kernel_size=2, stride=2), channels-last.

    x_nhwc : (N, H, W, C_in)   — f32 or (preferred) bf16
    weight : (C_in, C_out, 2, 2)   (PyTorch ConvTranspose2d layout)
    bias   : (C_out,)
    returns: (N, 2H, 2W, C_out) in out_dtype (default bf16)
    """
    N, H, W, C_in = x_nhwc.shape
    wc_in, C_out, kH, kW = weight.shape
    assert (kH, kW) == (2, 2) and wc_in == C_in

    x_flat = x_nhwc.reshape(N * H * W, C_in)  # contiguous NHWC -> free reshape
    rows_total = N * H

    x_itemsize = jnp.dtype(x_nhwc.dtype).itemsize
    out_itemsize = jnp.dtype(out_dtype).itemsize
    slab_bytes = C_in * 4 * C_out * jnp.dtype(compute_dtype).itemsize

    tile_budget, vmem_cap, target_tokens = _vmem_budget()

    if split_di is None:
        # Only worth splitting when the weight slab is a big fraction of a small
        # (v7x-class) VMEM budget — i.e. deep decoder levels (C_in >= 1024).
        split_di = slab_bytes >= (4 << 20) and tile_budget <= (48 << 20)

    cols_per_step = (2 if split_di else 4) * C_out
    # Double-buffered activation + output tiles per image row; weights resident
    # (non-split: 1 x slab via Buffered(1); split: 2 buffers x half slab == slab).
    per_row_bytes = 2 * W * (C_in * x_itemsize + cols_per_step * out_itemsize)
    fixed_bytes = slab_bytes + 2 * 4 * C_out * 4
    sub = _sublane_multiple(x_nhwc.dtype)

    if (rows_per_tile is None
            or rows_total % rows_per_tile != 0
            or ((rows_per_tile * W) % sub != 0 and rows_per_tile != rows_total)):
        rows_per_tile = _choose_rows_per_tile(rows_total, W, per_row_bytes,
                                              fixed_bytes, tile_budget,
                                              target_tokens, sub)
    tr = rows_per_tile

    working = tr * per_row_bytes + fixed_bytes
    vmem_limit = int(min(vmem_cap, max(32 << 20, (working * 3) // 2 + (2 << 20))))

    M = N * H * W
    flops = 2 * M * C_in * 4 * C_out
    bytes_accessed = (M * C_in * x_itemsize + slab_bytes + 4 * C_out * 4
                      + M * 4 * C_out * out_itemsize)
    cost = pl.CostEstimate(flops=flops, transcendentals=0,
                           bytes_accessed=bytes_accessed)
    out_shape = jax.ShapeDtypeStruct((rows_total, 2, W, 2 * C_out), out_dtype)

    if not split_di:
        # Pack weights: w_slab[ci, (di*2 + dj)*C_out + co] = weight[ci, co, di, dj]
        w_slab = jnp.transpose(weight, (0, 2, 3, 1)).reshape(C_in, 4 * C_out)
        w_slab = w_slab.astype(compute_dtype)
        b_slab = jnp.tile(bias.astype(jnp.float32), 4).reshape(1, 4 * C_out)
        kernel = functools.partial(_transp_conv_kernel, compute_dtype=compute_dtype)
        grid_spec = pltpu.PrefetchScalarGridSpec(
            num_scalar_prefetch=0,
            grid=(rows_total // tr,),
            in_specs=[
                pl.BlockSpec((tr * W, C_in), lambda i: (i, 0)),
                _const_spec((C_in, 4 * C_out), lambda i: (0, 0)),
                _const_spec((1, 4 * C_out), lambda i: (0, 0)),
            ],
            out_specs=pl.BlockSpec((tr, 2, W, 2 * C_out), lambda i: (i, 0, 0, 0)),
        )
        semantics = ("parallel",)
    else:
        # di is a second (inner) grid axis: per-step weight block and output tile are
        # halved; the x block index is unchanged across inner steps (not re-DMA'd).
        w_slab = jnp.transpose(weight, (2, 0, 3, 1)).reshape(2, C_in, 2 * C_out)
        w_slab = w_slab.astype(compute_dtype)
        b_slab = jnp.tile(bias.astype(jnp.float32), (2, 1, 2))  # (2, 1, 2*C_out)
        kernel = functools.partial(_transp_conv_kernel_split,
                                   compute_dtype=compute_dtype)
        grid_spec = pltpu.PrefetchScalarGridSpec(
            num_scalar_prefetch=0,
            grid=(rows_total // tr, 2),
            in_specs=[
                pl.BlockSpec((tr * W, C_in), lambda i, j: (i, 0)),
                pl.BlockSpec((1, C_in, 2 * C_out), lambda i, j: (j, 0, 0)),
                pl.BlockSpec((1, 1, 2 * C_out), lambda i, j: (j, 0, 0)),
            ],
            out_specs=pl.BlockSpec((tr, 1, W, 2 * C_out),
                                   lambda i, j: (i, j, 0, 0)),
        )
        semantics = ("parallel", "arbitrary")

    y = pl.pallas_call(
        kernel,
        out_shape=out_shape,
        grid_spec=grid_spec,
        compiler_params=pltpu.CompilerParams(
            dimension_semantics=semantics,
            vmem_limit_bytes=vmem_limit,
        ),
        cost_estimate=cost,
    )(x_flat, w_slab, b_slab)

    # (N*H, 2, W, 2*C_out) -> (N, 2H, 2W, C_out): adjacent-axis merges only (no copy).
    return y.reshape(N, 2 * H, 2 * W, C_out)


def upsample_block_transp_conv(x_nchw, weight, bias, **kwargs):
    """PyTorch-semantics adapter: NCHW in / NCHW out.

    The two transposes are harness glue for the NCHW reference; in a channels-last
    (NHWC) UNet they disappear and only the kernel path remains.
    """
    x_nhwc = jnp.transpose(x_nchw, (0, 2, 3, 1))
    y_nhwc = upsample_transp_conv_nhwc(x_nhwc, weight, bias, **kwargs)
    return jnp.transpose(y_nhwc, (0, 3, 1, 2))


def _reference_transp_conv(x, weight, bias):
    # out[n, co, 2i+di, 2j+dj] = sum_ci x[n,ci,i,j] * W[ci,co,di,dj] + b[co]
    N, C_in, H, W = x.shape
    _, C_out, _, _ = weight.shape
    y = jnp.einsum("ncij,codk->noidjk", x, weight)  # (N, C_out, H, 2, W, 2)
    return y.reshape(N, C_out, 2 * H, 2 * W) + bias[None, :, None, None]


if __name__ == "__main__":
    key = jax.random.PRNGKey(0)
    k1, k2, k3, k4, k5, k6 = jax.random.split(key, 6)

    # ---- Test 1: small shapes, f32 activations, bf16 output (default fast path) ----
    N, C_in, C_out, H, W = 2, 4, 8, 16, 16
    x = jax.random.normal(k1, (N, C_in, H, W), dtype=jnp.float32)
    bound = 1.0 / jnp.sqrt(jnp.float32(C_in * 2 * 2))
    weight = jax.random.uniform(k2, (C_in, C_out, 2, 2), jnp.float32, -bound, bound)
    bias = jax.random.uniform(k3, (C_out,), jnp.float32, -bound, bound)

    xq = x.astype(jnp.bfloat16).astype(jnp.float32)
    wq = weight.astype(jnp.bfloat16).astype(jnp.float32)
    ref_q = _reference_transp_conv(xq, wq, bias)
    ref_f32 = _reference_transp_conv(x, weight, bias)

    fwd_bf16 = jax.jit(functools.partial(upsample_block_transp_conv, rows_per_tile=8))
    out_bf16 = jax.block_until_ready(fwd_bf16(x, weight, bias))
    assert out_bf16.shape == (N, C_out, 2 * H, 2 * W)
    assert out_bf16.dtype == jnp.bfloat16
    assert jnp.allclose(out_bf16.astype(jnp.float32), ref_q, atol=2e-2, rtol=2e-2)

    # Same kernel with f32 output: tight check against the bf16-operand reference,
    # loose check against the pure-f32 reference.
    fwd_f32 = jax.jit(functools.partial(upsample_block_transp_conv,
                                        rows_per_tile=8, out_dtype=jnp.float32))
    out_f32 = jax.block_until_ready(fwd_f32(x, weight, bias))
    assert jnp.allclose(out_f32, ref_q, atol=1e-4, rtol=1e-4)
    assert jnp.allclose(out_f32, ref_f32, atol=5e-2, rtol=5e-2)

    # ---- Test 2: bf16 activations end-to-end, lane-dense output (2*C_out = 128) ----
    N2, C_in2, C_out2, H2, W2 = 1, 32, 64, 8, 8
    x2 = jax.random.normal(k4, (N2, C_in2, H2, W2), dtype=jnp.float32)
    bound2 = 1.0 / jnp.sqrt(jnp.float32(C_in2 * 2 * 2))
    w2 = jax.random.uniform(k5, (C_in2, C_out2, 2, 2), jnp.float32, -bound2, bound2)
    b2 = jax.random.uniform(k6, (C_out2,), jnp.float32, -bound2, bound2)

    x2_bf16 = x2.astype(jnp.bfloat16)
    ref2_q = _reference_transp_conv(x2_bf16.astype(jnp.float32),
                                    w2.astype(jnp.bfloat16).astype(jnp.float32), b2)

    fwd2 = jax.jit(functools.partial(upsample_block_transp_conv, rows_per_tile=2))
    out2 = jax.block_until_ready(fwd2(x2_bf16, w2, b2))
    assert out2.shape == (N2, C_out2, 2 * H2, 2 * W2)
    assert out2.dtype == jnp.bfloat16
    assert jnp.allclose(out2.astype(jnp.float32), ref2_q, atol=2e-2, rtol=2e-2)

    # ---- Test 3: di-split grid path (deep-level / v7x tiling), forced on ----
    fwd3 = jax.jit(functools.partial(upsample_block_transp_conv,
                                     rows_per_tile=4, split_di=True))
    out3 = jax.block_until_ready(fwd3(x2_bf16, w2, b2))
    assert out3.shape == (N2, C_out2, 2 * H2, 2 * W2)
    assert jnp.allclose(out3.astype(jnp.float32), ref2_q, atol=2e-2, rtol=2e-2)

    print("KERNEL_OK")
</pallas_src>

<mosaic_0001>
module attributes {stable_mosaic.version = 11 : i64} {
  func.func @_transp_conv_kernel(%arg0: i32, %arg1: memref<128x4xf32, #tpu.memory_space<vmem>>, %arg2: memref<4x32xbf16, #tpu.memory_space<vmem>>, %arg3: memref<1x32xf32, #tpu.memory_space<vmem>>, %arg4: memref<8x2x16x16xbf16, #tpu.memory_space<vmem>>) attributes {dimension_semantics = [#tpu.dimension_semantics<parallel>], iteration_bounds = array<i64: 4>, scalar_prefetch = 0 : i64, scratch_operands = 0 : i64, tpu.core_type = #tpu.core_type<tc>, window_params = [{transform_indices = @transform_0, window_bounds = array<i64: 128, 4>}, {pipeline_mode = #tpu.pipeline_mode<synchronous>, transform_indices = @transform_1, window_bounds = array<i64: 4, 32>}, {pipeline_mode = #tpu.pipeline_mode<synchronous>, transform_indices = @transform_2, window_bounds = array<i64: 1, 32>}, {transform_indices = @transform_3, window_bounds = array<i64: 8, 2, 16, 16>}]} {
    %c0 = arith.constant 0 : index
    %c0_0 = arith.constant 0 : index
    %0 = vector.load %arg1[%c0, %c0_0] : memref<128x4xf32, #tpu.memory_space<vmem>>, vector<128x4xf32>
    %1 = arith.truncf %0 : vector<128x4xf32> to vector<128x4xbf16>
    %c0_1 = arith.constant 0 : index
    %c0_2 = arith.constant 0 : index
    %2 = vector.load %arg2[%c0_1, %c0_2] : memref<4x32xbf16, #tpu.memory_space<vmem>>, vector<4x32xbf16>
    %cst = arith.constant dense<0.000000e+00> : vector<128x32xf32>
    %3 = tpu.matmul %1, %2, %cst {dimension_numbers = #tpu.dot_dimension_numbers<[1], [0], [0], [1], [0, 0, 1, 1], [], []>} : vector<128x4xbf16>, vector<4x32xbf16>, vector<128x32xf32> -> vector<128x32xf32>
    %c0_3 = arith.constant 0 : index
    %c0_4 = arith.constant 0 : index
    %4 = vector.load %arg3[%c0_3, %c0_4] : memref<1x32xf32, #tpu.memory_space<vmem>>, vector<1x32xf32>
    %5 = vector.broadcast %4 : vector<1x32xf32> to vector<128x32xf32>
    %6 = arith.addf %3, %5 : vector<128x32xf32>
    %7 = arith.truncf %6 : vector<128x32xf32> to vector<128x32xbf16>
    %8 = vector.extract_strided_slice %7 {offsets = [0, 0], sizes = [128, 16], strides = [1, 1]} : vector<128x32xbf16> to vector<128x16xbf16>
    %9 = vector.shape_cast %8 : vector<128x16xbf16> to vector<8x16x16xbf16>
    %c0_5 = arith.constant 0 : index
    %c0_6 = arith.constant 0 : index
    %c0_7 = arith.constant 0 : index
    %c0_8 = arith.constant 0 : index
    %10 = vector.load %arg4[%c0_5, %c0_6, %c0_7, %c0_8] : memref<8x2x16x16xbf16, #tpu.memory_space<vmem>>, vector<8x1x16x16xbf16>
    %11 = vector.shape_cast %10 : vector<8x1x16x16xbf16> to vector<8x16x16xbf16>
    %12 = vector.shape_cast %9 : vector<8x16x16xbf16> to vector<8x1x16x16xbf16>
    tpu.vector_store %arg4[%c0_5, %c0_6, %c0_7, %c0_8], %12 {strides = array<i32>} : memref<8x2x16x16xbf16, #tpu.memory_space<vmem>>, vector<8x1x16x16xbf16>,
    %13 = vector.extract_strided_slice %7 {offsets = [0, 16], sizes = [128, 16], strides = [1, 1]} : vector<128x32xbf16> to vector<128x16xbf16>
    %14 = vector.shape_cast %13 : vector<128x16xbf16> to vector<8x16x16xbf16>
    %c0_9 = arith.constant 0 : index
    %c1 = arith.constant 1 : index
    %c0_10 = arith.constant 0 : index
    %c0_11 = arith.constant 0 : index
    %15 = vector.load %arg4[%c0_9, %c1, %c0_10, %c0_11] : memref<8x2x16x16xbf16, #tpu.memory_space<vmem>>, vector<8x1x16x16xbf16>
    %16 = vector.shape_cast %15 : vector<8x1x16x16xbf16> to vector<8x16x16xbf16>
    %17 = vector.shape_cast %14 : vector<8x16x16xbf16> to vector<8x1x16x16xbf16>
    tpu.vector_store %arg4[%c0_9, %c1, %c0_10, %c0_11], %17 {strides = array<i32>} : memref<8x2x16x16xbf16, #tpu.memory_space<vmem>>, vector<8x1x16x16xbf16>,
    return
  }
  func.func @transform_0(%arg0: i32) -> (i32, i32) {
    %c0_i32 = arith.constant 0 : i32
    %c0_i32_0 = arith.constant 0 : i32
    return %arg0, %c0_i32 : i32, i32
  }
  func.func @transform_1(%arg0: i32) -> (i32, i32) {
    %c0_i32 = arith.constant 0 : i32
    %c0_i32_0 = arith.constant 0 : i32
    %c0_i32_1 = arith.constant 0 : i32
    return %c0_i32, %c0_i32_0 : i32, i32
  }
  func.func @transform_2(%arg0: i32) -> (i32, i32) {
    %c0_i32 = arith.constant 0 : i32
    %c0_i32_0 = arith.constant 0 : i32
    %c0_i32_1 = arith.constant 0 : i32
    return %c0_i32, %c0_i32_0 : i32, i32
  }
  func.func @transform_3(%arg0: i32) -> (i32, i32, i32, i32) {
    %c0_i32 = arith.constant 0 : i32
    %c0_i32_0 = arith.constant 0 : i32
    %c0_i32_1 = arith.constant 0 : i32
    %c0_i32_2 = arith.constant 0 : i32
    return %arg0, %c0_i32, %c0_i32_0, %c0_i32_1 : i32, i32, i32, i32
  }
}

</mosaic_0001>

<bundles_post_ra>
// kernel: tile.9
= control target key start
LH: loop header
LB: loop body
LE: loop exit
PB: predicated region body
PF: predicated region fallthrough
CT: control target
= control target key end

     0   :  { %s37_s8 = smov 8   ;;  %s38_s9 = smov 16   ;;  %vm7_vm0 = vcmask 64512   ;;  %vm13_vm1 = vcmask 261312   ;;  %vm19_vm2 = vcmask 195712   ;;  %vm25_vm3 = vcmask 130112   ;;  %s55_s0 = inlined_call_operand.vmem [shape: f32[4,8], index: 0, kind: input, shape index: {}]   ;;  %s56_s1 = inlined_call_operand.vmem [shape: f32[1,32], index: 1, kind: output, shape index: {}]  }
   0x1   :  { %v4_v0 = vld [vmem:[%s55_s0] sm:$0xf]  ;;  %s36_s0 = smov 24  }
   0x2   :  { %5 = vst [vmem:[#allocation1] sm:$0xf] %v4_v0 }
   0x9   :  { %v10_v1 = vld [vmem:[#allocation1 + $0x3] sm:$0x1]   ;;  %v22_v2 = vld [vmem:[#allocation1 + $0x1] sm:$0x1]   ;;  %v16_v3 = vld [vmem:[#allocation1 + $0x2] sm:$0x1]  }
   0xa   :  { %11 = vrot.lane.b32.xlu0 %v10_v1, %s36_s0  ;;  %23 = vrot.lane.b32.xlu1 %v22_v2, %s37_s8  ;;  %v6_v4 = vld [vmem:[#allocation1] sm:$0x1]  }
   0xb   :  { %8 = vst.msk [vmem:[#allocation0] sm:$0x1] %vm7_vm0, %v6_v4  }
  0x12   :  { %17 = vrot.lane.b32.xlu0 %v16_v3, %s38_s9 }
  0x7c   :  { %v12_v5 = vpop.permute.xlu0 %11   ;;  %v24_v6 = vpop.permute.xlu1 %23  }
  0x7d   :  { %14 = vst.msk [vmem:[#allocation0] sm:$0x1] %vm13_vm1, %v12_v5  }
  0x84   :  { %v18_v7 = vpop.permute.xlu0 %17  }
  0x85   :  { %20 = vst.msk [vmem:[#allocation0] sm:$0x1] %vm19_vm2, %v18_v7  }
  0x86   :  { %26 = vst.msk [vmem:[#allocation0] sm:$0x1] %vm25_vm3, %v24_v6  }
  0x8d   :  { %v29_v8 = vld [vmem:[#allocation0] sm:$0x1] }
  0x8e   :  { %32 = vst [vmem:[%s56_s1] sm:$0x1] %v29_v8 }

// kernel: tile.8
= control target key start
LH: loop header
LB: loop body
LE: loop exit
PB: predicated region body
PF: predicated region fallthrough
CT: control target
= control target key end

     0   :  { %s22_s0 = inlined_call_operand.vmem [shape: f32[8], index: 0, kind: input, shape index: {}]   ;;  %s23_s1 = inlined_call_operand.vmem [shape: f32[4,8], index: 1, kind: output, shape index: {}]  }
   0x1   :  { %v4_v0 = vld [vmem:[%s22_s0] ss:$0 sm:$0xff] }
   0x2   :  { %5 = vst [vmem:[%s23_s1] sm:$0xf] %v4_v0 }

// kernel: upsample_block_transp_conv.1
= control target key start
LH: loop header
LB: loop body
LE: loop exit
PB: predicated region body
PF: predicated region fallthrough
CT: control target
= control target key end

     0   :  { %s535_s12 = smov 0   ;;  %s670_s0 = inlined_call_operand.vmem [shape: f32[512,4], index: 0, kind: input, shape index: {}]   ;;  %s671_s1 = inlined_call_operand.vmem [shape: bf16[4,32], index: 1, kind: input, shape index: {}]   ;;  %s672_s2 = inlined_call_operand.vmem [shape: f32[1,32], index: 2, kind: input, shape index: {}]   ;;  %s673_s3 = inlined_call_operand.vmem [shape: bf16[32,2,16,16], index: 3, kind: output, shape index: {}]  }
   0x1 LB: > { %s456_s13 = sadd.s32 4294967295, %s512_s12   ;;  %p460_p0 = scmp.ge.s32.totalorder %s512_s12, 1  ;;  %s512_s12 = sphi %s535_s12, %s13_s12  }
   0x2   : > { %p138_p1 = scmp.lt.s32.totalorder %s512_s12, 5 }
   0x4   : > { %p139_p2 = pnand %p460_p0, %p138_p1 }
   0x5   : > { %s461_s16 = sshll.u32 (!%p139_p2), %s456_s13, 4  ;;  %s463_s21 = sshll.u32 (!%p139_p2), %s456_s13, 3 }
   0x6   : > { %142 = sbr.rel (%p139_p2) target bundleno = 311 (0x137), region = 32  ;;  %p164_p3 = scmp.lt.s32.totalorder (!%p139_p2), %s461_s16, 63 }
   0x7   : > { %p170_p4 = scmp.lt.s32.totalorder (!%p139_p2), %s463_s21, 31  ;;  %s514_s28 = smov (!%p139_p2), 112  }
   0xb   : > { %v201_v0 = vld [vmem:[%s671_s1] sm:$0x3]  ;;  %vm231_vm0 = vcmask 1041408   ;;  %s675_s16 = smov (!%p164_p3, %s461_s16), 63  ;;  %vm206_vm1 = vcmask 31744   ;;  %s677_s21 = smov (!%p170_p4, %s463_s21), 31 }
   0xc   : > { %v233_v1 = vsel %vm231_vm0, %v201_v0, 0  ;;  %s462_s17 = sshll.u32 %s675_s16, 3  ;;  %v564_v26 = vld [vmem:[%s672_s2] ss:$0 sm:$0xff]  ;;  %s492_s24 = sshll.u32 %s677_s21, 4  ;;  %vm300_vm2 = vcmask 125952  }
   0xd   : > { %242 = vmatpush.bf16.msra.mxu0 %v233_v1  ;;  %493 = vmatpush.bf16.msra.mxu1 %v233_v1  ;;  %s167_s20 = scalar_lea.vmem %s670_s0, %s462_s17  ;;  %s570_s27 = scalar_lea.vmem %s673_s3, %s492_s24 }
   0xe   : > { %494 = vmatpush.bf16.msra.mxu2 %v233_v1  ;;  %495 = vmatpush.bf16.msra.mxu3 %v233_v1  ;;  %v177_v2 = vld [vmem:[%s167_s20] sm:$0xff]  ;;  %v178_v3 = vld [vmem:[%s167_s20 + $0x8] sm:$0xff]  ;;  %v179_v14 = vld [vmem:[%s167_s20 + $0x10] sm:$0xff] }
   0xf   : > { %v181_v4 = vld [vmem:[%s167_s20 + $0x20] sm:$0xff]  ;;  %v193_v5 = vpack.c.bf16 %v178_v3, %v177_v2  ;;  %v182_v6 = vld [vmem:[%s167_s20 + $0x28] sm:$0xff]  ;;  %v180_v15 = vld [vmem:[%s167_s20 + $0x18] sm:$0xff] }
  0x10   : > { %v185_v7 = vld [vmem:[%s167_s20 + $0x40] sm:$0xff]  ;;  %v186_v8 = vld [vmem:[%s167_s20 + $0x48] sm:$0xff]  ;;  %v195_v9 = vpack.c.bf16 %v182_v6, %v181_v4  ;;  %v187_v16 = vld [vmem:[%s167_s20 + $0x50] sm:$0xff]  ;;  %v194_v22 = vpack.c.bf16 %v180_v15, %v179_v14 }
  0x11   : > { %v197_v10 = vpack.c.bf16 %v186_v8, %v185_v7  ;;  %v189_v11 = vld [vmem:[%s167_s20 + $0x60] sm:$0xff]  ;;  %v190_v12 = vld [vmem:[%s167_s20 + $0x68] sm:$0xff]  ;;  %466 = vmatmul.msk.bf16.vlgmr.msra.gmra.mxu0 %vm206_vm1, %v193_v5  ;;  %v188_v17 = vld [vmem:[%s167_s20 + $0x58] sm:$0xff] }
  0x12   : > { %v199_v13 = vpack.c.bf16 %v190_v12, %v189_v11  ;;  %468 = vmatmul.msk.bf16.vlgmr.msra.gmra.mxu1 %vm206_vm1, %v195_v9  ;;  %v183_v18 = vld [vmem:[%s167_s20 + $0x30] sm:$0xff]  ;;  %v184_v19 = vld [vmem:[%s167_s20 + $0x38] sm:$0xff]  ;;  %v198_v23 = vpack.c.bf16 %v188_v17, %v187_v16 }
  0x13   : > { %470 = vmatmul.msk.bf16.vlgmr.msra.gmra.mxu2 %vm206_vm1, %v197_v10  ;;  %v191_v20 = vld [vmem:[%s167_s20 + $0x70] sm:$0xff]  ;;  %v192_v21 = vld [vmem:[%s167_s20 + $0x78] sm:$0xff]  ;;  %v196_v24 = vpack.c.bf16 %v184_v19, %v183_v18 }
  0x14   : > { %472 = vmatmul.msk.bf16.vlgmr.msra.gmra.mxu3 %vm206_vm1, %v199_v13  ;;  %v200_v25 = vpack.c.bf16 %v192_v21, %v191_v20 }
  0x21   : > { %467 = vmatmul.msk.bf16.gmra.mxu0 %vm206_vm1, %v194_v22 }
  0x22   : > { %469 = vmatmul.msk.bf16.gmra.mxu1 %vm206_vm1, %v196_v24 }
  0x23   : > { %471 = vmatmul.msk.bf16.gmra.mxu2 %vm206_vm1, %v198_v23 }
  0x24   : > { %473 = vmatmul.msk.bf16.gmra.mxu3 %vm206_vm1, %v200_v25 }
  0x8e   : > { %v244_v27 = vpop.f32.mrf.mxu0 }
  0x8f   : > { %v245_v28 = vadd.f32 %v564_v26, %v244_v27  ;;  %v254_v29 = vpop.f32.mrf.mxu1 }
  0x90   : > { %v255_v30 = vadd.f32 %v564_v26, %v254_v29 }
  0x91   : > { %v284_v31 = vpack.c.bf16 %v245_v28, %v245_v28 }
  0x92   : > { %v288_v32 = vpack.c.bf16 %v255_v30, %v255_v30 }
  0x93   : > { %301 = vst.msk [vmem:[%s570_s27] sm:$0xf] %vm300_vm2, %v284_v31  ;;  %333 = vrot.lane.b32.xlu0 %v284_v31, %s514_s28 }
  0x94   : > { %305 = vst.msk [vmem:[%s570_s27 + $0x20] sm:$0xf] %vm300_vm2, %v288_v32  ;;  %341 = vrot.lane.b32.xlu2 %v288_v32, %s514_s28 }
  0x96   : > { %v264_v33 = vpop.f32.mrf.mxu2  ;;  %v246_v35 = vpop.f32.mrf.mxu0 }
  0x97   : > { %v265_v34 = vadd.f32 %v564_v26, %v264_v33  ;;  %v274_v36 = vpop.f32.mrf.mxu3  ;;  %v247_v37 = vadd.f32 %v564_v26, %v246_v35  ;;  %v256_v39 = vpop.f32.mrf.mxu1 }
  0x98   : > { %v275_v38 = vadd.f32 %v564_v26, %v274_v36  ;;  %v257_v41 = vadd.f32 %v564_v26, %v256_v39 }
  0x99   : > { %v292_v40 = vpack.c.bf16 %v265_v34, %v265_v34  ;;  %v285_v42 = vpack.c.bf16 %v247_v37, %v247_v37 }
  0x9a   : > { %v296_v43 = vpack.c.bf16 %v275_v38, %v275_v38  ;;  %v289_v44 = vpack.c.bf16 %v257_v41, %v257_v41 }
  0x9b   : > { %309 = vst.msk [vmem:[%s570_s27 + $0x40] sm:$0xf] %vm300_vm2, %v292_v40 }
  0x9c   : > { %302 = vst.msk [vmem:[%s570_s27 + $0x4] sm:$0xf] %vm300_vm2, %v285_v42  ;;  %357 = vrot.lane.b32.xlu0 %v296_v43, %s514_s28  ;;  %349 = vrot.lane.b32.xlu2 %v292_v40, %s514_s28 }
  0x9d   : > { %313 = vst.msk [vmem:[%s570_s27 + $0x60] sm:$0xf] %vm300_vm2, %v296_v43 }
  0x9e   : > { %v266_v45 = vpop.f32.mrf.mxu2  ;;  %306 = vst.msk [vmem:[%s570_s27 + $0x24] sm:$0xf] %vm300_vm2, %v289_v44  ;;  %v249_v47 = vpop.f32.mrf.mxu0 }
  0x9f   : > { %v267_v46 = vadd.f32 %v564_v26, %v266_v45  ;;  %v276_v48 = vpop.f32.mrf.mxu3  ;;  %v250_v49 = vadd.f32 %v564_v26, %v249_v47  ;;  %v259_v51 = vpop.f32.mrf.mxu1 }
  0xa0   : > { %v277_v50 = vadd.f32 %v564_v26, %v276_v48  ;;  %v260_v53 = vadd.f32 %v564_v26, %v259_v51 }
  0xa1   : > { %v293_v52 = vpack.c.bf16 %v267_v46, %v267_v46  ;;  %v286_v54 = vpack.c.bf16 %v250_v49, %v250_v49 }
  0xa2   : > { %v297_v55 = vpack.c.bf16 %v277_v50, %v277_v50  ;;  %v290_v56 = vpack.c.bf16 %v260_v53, %v260_v53 }
  0xa3   : > { %310 = vst.msk [vmem:[%s570_s27 + $0x44] sm:$0xf] %vm300_vm2, %v293_v52  ;;  %337 = vrot.lane.b32.xlu1 %v286_v54, %s514_s28 }
  0xa4   : > { %303 = vst.msk [vmem:[%s570_s27 + $0x10] sm:$0xf] %vm300_vm2, %v286_v54  ;;  %335 = vrot.lane.b32.xlu0 %v285_v42, %s514_s28  ;;  %343 = vrot.lane.b32.xlu2 %v289_v44, %s514_s28 }
  0xa5   : > { %314 = vst.msk [vmem:[%s570_s27 + $0x64] sm:$0xf] %vm300_vm2, %v297_v55 }
  0xa6   : > { %v269_v57 = vpop.f32.mrf.mxu2  ;;  %307 = vst.msk [vmem:[%s570_s27 + $0x30] sm:$0xf] %vm300_vm2, %v290_v56  ;;  %v251_v59 = vpop.f32.mrf.mxu0 }
  0xa7   : > { %v270_v58 = vadd.f32 %v564_v26, %v269_v57  ;;  %v279_v60 = vpop.f32.mrf.mxu3  ;;  %v252_v61 = vadd.f32 %v564_v26, %v251_v59  ;;  %v261_v62 = vpop.f32.mrf.mxu1 }
  0xa8   : > { %v280_v63 = vadd.f32 %v564_v26, %v279_v60  ;;  %v262_v1 = vadd.f32 %v564_v26, %v261_v62 }
  0xa9   : > { %v294_v0 = vpack.c.bf16 %v270_v58, %v270_v58  ;;  %v287_v2 = vpack.c.bf16 %v252_v61, %v252_v61 }
  0xaa   : > { %v298_v3 = vpack.c.bf16 %v280_v63, %v280_v63  ;;  %v291_v4 = vpack.c.bf16 %v262_v1, %v262_v1 }
  0xab   : > { %311 = vst.msk [vmem:[%s570_s27 + $0x50] sm:$0xf] %vm300_vm2, %v294_v0  ;;  %353 = vrot.lane.b32.xlu1 %v294_v0, %s514_s28 }
  0xac   : > { %304 = vst.msk [vmem:[%s570_s27 + $0x14] sm:$0xf] %vm300_vm2, %v287_v2  ;;  %351 = vrot.lane.b32.xlu0 %v293_v52, %s514_s28 }
  0xad   : > { %308 = vst.msk [vmem:[%s570_s27 + $0x34] sm:$0xf] %vm300_vm2, %v291_v4 }
  0xae   : > { %v271_v5 = vpop.f32.mrf.mxu2  ;;  %315 = vst.msk [vmem:[%s570_s27 + $0x70] sm:$0xf] %vm300_vm2, %v298_v3 }
  0xaf   : > { %v272_v6 = vadd.f32 %v564_v26, %v271_v5  ;;  %v281_v7 = vpop.f32.mrf.mxu3 }
  0xb0   : > { %v282_v8 = vadd.f32 %v564_v26, %v281_v7 }
  0xb1   : > { %v295_v9 = vpack.c.bf16 %v272_v6, %v272_v6 }
  0xb2   : > { %v299_v10 = vpack.c.bf16 %v282_v8, %v282_v8 }
  0xb3   : > { %312 = vst.msk [vmem:[%s570_s27 + $0x54] sm:$0xf] %vm300_vm2, %v295_v9  ;;  %355 = vrot.lane.b32.xlu2 %v295_v9, %s514_s28  ;;  %339 = vrot.lane.b32.xlu1 %v287_v2, %s514_s28 }
  0xb4   : > { %345 = vrot.lane.b32.xlu0 %v290_v56, %s514_s28  ;;  %316 = vst.msk [vmem:[%s570_s27 + $0x74] sm:$0xf] %vm300_vm2, %v299_v10 }
  0xbb   : > { %361 = vrot.lane.b32.xlu2 %v298_v3, %s514_s28  ;;  %347 = vrot.lane.b32.xlu1 %v291_v4, %s514_s28 }
  0xbc   : > { %363 = vrot.lane.b32.xlu0 %v299_v10, %s514_s28 }
  0xc3   : > { %359 = vrot.lane.b32.xlu1 %v297_v55, %s514_s28 }
  0xee   : > { %v342_v11 = vpop.permute.xlu2 %341 }
  0xef   : > { %478 = vst.msk [vmem:[%s570_s27 + $0x28] sm:$0xf] %vm300_vm2, %v342_v11 }
  0xf6   : > { %v350_v12 = vpop.permute.xlu2 %349 }
  0xf7   : > { %482 = vst.msk [vmem:[%s570_s27 + $0x48] sm:$0xf] %vm300_vm2, %v350_v12 }
  0xfe   : > { %v344_v13 = vpop.permute.xlu2 %343 }
  0xff   : > { %479 = vst.msk [vmem:[%s570_s27 + $0x2c] sm:$0xf] %vm300_vm2, %v344_v13 }
 0x105   : > { %v334_v14 = vpop.permute.xlu0 %333 }
 0x106   : > { %474 = vst.msk [vmem:[%s570_s27 + $0x8] sm:$0xf] %vm300_vm2, %v334_v14 }
 0x10d   : > { %v356_v15 = vpop.permute.xlu2 %355 }
 0x10e   : > { %485 = vst.msk [vmem:[%s570_s27 + $0x5c] sm:$0xf] %vm300_vm2, %v356_v15  ;;  %v358_v16 = vpop.permute.xlu0 %357 }
 0x10f   : > { %486 = vst.msk [vmem:[%s570_s27 + $0x68] sm:$0xf] %vm300_vm2, %v358_v16 }
 0x115   : > { %v362_v17 = vpop.permute.xlu2 %361  ;;  %v338_v18 = vpop.permute.xlu1 %337 }
 0x116   : > { %488 = vst.msk [vmem:[%s570_s27 + $0x78] sm:$0xf] %vm300_vm2, %v362_v17  ;;  %v336_v19 = vpop.permute.xlu0 %335 }
 0x117   : > { %476 = vst.msk [vmem:[%s570_s27 + $0x18] sm:$0xf] %vm300_vm2, %v338_v18 }
 0x118   : > { %475 = vst.msk [vmem:[%s570_s27 + $0xc] sm:$0xf] %vm300_vm2, %v336_v19 }
 0x11d   : > { %v354_v20 = vpop.permute.xlu1 %353 }
 0x11e   : > { %v352_v21 = vpop.permute.xlu0 %351  ;;  %484 = vst.msk [vmem:[%s570_s27 + $0x58] sm:$0xf] %vm300_vm2, %v354_v20 }
 0x11f   : > { %483 = vst.msk [vmem:[%s570_s27 + $0x4c] sm:$0xf] %vm300_vm2, %v352_v21 }
 0x125   : > { %v340_v22 = vpop.permute.xlu1 %339 }
 0x126   : > { %v346_v23 = vpop.permute.xlu0 %345  ;;  %477 = vst.msk [vmem:[%s570_s27 + $0x1c] sm:$0xf] %vm300_vm2, %v340_v22 }
 0x127   : > { %480 = vst.msk [vmem:[%s570_s27 + $0x38] sm:$0xf] %vm300_vm2, %v346_v23 }
 0x12d   : > { %v348_v24 = vpop.permute.xlu1 %347 }
 0x12e   : > { %v364_v25 = vpop.permute.xlu0 %363  ;;  %481 = vst.msk [vmem:[%s570_s27 + $0x3c] sm:$0xf] %vm300_vm2, %v348_v24 }
 0x12f   : > { %489 = vst.msk [vmem:[%s570_s27 + $0x7c] sm:$0xf] %vm300_vm2, %v364_v25 }
 0x135   : > { %v360_v26 = vpop.permute.xlu1 %359 }
 0x136   : > { %487 = vst.msk [vmem:[%s570_s27 + $0x6c] sm:$0xf] %vm300_vm2, %v360_v26 }
 0x137 PF: > { %s13_s12 = sadd.s32 1, %s512_s12  }
 0x138   : > { %p10_p5 = scmp.ge.s32.totalorder %s13_s12, 6  }
 0x13a   :  { %12 = sbr.rel (!%p10_p5) target bundleno = 1 (0x1), region = 63 }

</bundles_post_ra>
